<compile_context>
chip_gen: v6e
topology: v6e:2x2x1
jax: 0.10.0
libtpu: 0.0.40
codegen_flags: <defaults>
</compile_context>

<pallas_src>
import jax
import jax.numpy as jnp
from jax.experimental import pallas as pl
from jax.experimental.pallas import tpu as pltpu

_VMEM_LIMIT = 32 * 1024 * 1024  # safe on v5e/v6e (128 MiB) and v7x (64 MiB) VMEM


# ----------------------------- Pallas kernels ------------------------------

def _conv_relu_pool_kernel(p_ref, w_ref, b_ref, o_ref):
    """Fused conv (im2col matmul) + bias + ReLU + 2x2 maxpool.

    p_ref: (4, K, tm)  bf16  im2col patches, one slab per 2x2-pool quadrant
    w_ref: (Cout, K)   bf16  flattened conv weight (torch flatten order)
    b_ref: (Cout, 1)   f32   bias
    o_ref: (Cout, tm)  bf16  pooled activations, channel-major (lane dim = tm)
    """
    w = w_ref[...]
    # max over the four pool quadrants == maxpool; bias is identical across
    # quadrants and ReLU is monotone, so max(dot) + b then ReLU is exact.
    acc = jnp.dot(w, p_ref[0], preferred_element_type=jnp.float32)
    for q in range(1, 4):
        acc = jnp.maximum(acc, jnp.dot(w, p_ref[q],
                                       preferred_element_type=jnp.float32))
    y = jnp.maximum(acc + b_ref[...], 0.0)
    o_ref[...] = y.astype(o_ref.dtype)


def _fc_softmax_kernel(h_ref, w1_ref, b1_ref, w2_ref, b2_ref, w3_ref, b3_ref,
                       o_ref):
    """Fused fc1 -> ReLU -> fc2 -> ReLU -> fc3 -> softmax(dim=1).

    NOTE: the softmax is only correct because the full class dimension (N=10)
    lives in a single block -- the last dim is never tiled across the grid.
    """
    h = h_ref[...]                                                  # (tb,256) bf16
    z1 = jnp.dot(h, w1_ref[...], preferred_element_type=jnp.float32) + b1_ref[...]
    a1 = jnp.maximum(z1, 0.0).astype(jnp.bfloat16)
    z2 = jnp.dot(a1, w2_ref[...], preferred_element_type=jnp.float32) + b2_ref[...]
    a2 = jnp.maximum(z2, 0.0).astype(jnp.bfloat16)
    z3 = jnp.dot(a2, w3_ref[...], preferred_element_type=jnp.float32) + b3_ref[...]
    m = jnp.max(z3, axis=1, keepdims=True)
    e = jnp.exp(z3 - m)
    inv = pl.reciprocal(jnp.sum(e, axis=1, keepdims=True), approx=True)
    o_ref[...] = (e * inv).astype(o_ref.dtype)


# ------------------------------ tiling helpers ------------------------------

def _pick_lane_tile(m, cap=2048):
    """Largest multiple of 128 that divides m (<= cap); else the full dim."""
    best = m
    t = 128
    while t <= min(m, cap):
        if m % t == 0:
            best = t
        t += 128
    return best


def _pick_row_tile(m, cap=512):
    """Largest multiple of 8 that divides m (<= cap); else the full dim."""
    best = m
    t = 8
    while t <= min(m, cap):
        if m % t == 0:
            best = t
        t += 8
    return best


# ------------------------------ glue + wrappers ------------------------------

def _quad_patches(a, k):
    """Channel-major (Cin, B, H, W) -> (4, Cin*k*k, B*OHp*OWp) im2col patches,
    one slab per 2x2-maxpool quadrant.  K order is (c, kh, kw), matching the
    torch weight flatten; M order is (b, ph, pw)."""
    # TODO(synk): at large batch, fuse patch extraction into the kernel
    # (strided VMEM reads) to avoid the k*k HBM read amplification of im2col.
    cin, bsz, h, w = a.shape
    oh, ow = h - k + 1, w - k + 1
    ohp, owp = oh // 2, ow // 2
    mp = bsz * ohp * owp
    # unique strided taps: start offsets in [0, k]
    taps = {}
    for r in range(k + 1):
        for c in range(k + 1):
            taps[(r, c)] = a[:, :, r::2, c::2][:, :, :ohp, :owp]    # (Cin,B,OHp,OWp)
    quads = []
    for qh in (0, 1):
        for qw in (0, 1):
            sl = [taps[(qh + kh, qw + kw)] for kh in range(k) for kw in range(k)]
            p = jnp.stack(sl, axis=1)                               # (Cin,k*k,B,OHp,OWp)
            quads.append(p.reshape(cin * k * k, mp))
    return jnp.stack(quads, axis=0), ohp, owp


def conv_relu_pool(a_cm, w, b):
    """Conv2d(k, stride=1, valid) + ReLU + MaxPool2d(2), fused in one pallas_call.

    a_cm: (Cin, B, H, W) channel-major activations
    w:    (Cout, Cin, k, k) torch-layout weight,  b: (Cout,) bias
    returns (Cout, B, OH//2, OW//2) channel-major bf16
    """
    cout, cin, k, _ = w.shape
    bsz = a_cm.shape[1]
    patches, ohp, owp = _quad_patches(a_cm.astype(jnp.bfloat16), k)
    kk = cin * k * k
    mp = bsz * ohp * owp
    wt = w.reshape(cout, kk).astype(jnp.bfloat16)
    bias = b.reshape(cout, 1).astype(jnp.float32)

    tm = _pick_lane_tile(mp)
    grid = (mp // tm,)
    out = pl.pallas_call(
        _conv_relu_pool_kernel,
        out_shape=jax.ShapeDtypeStruct((cout, mp), jnp.bfloat16),
        grid=grid,
        in_specs=[
            pl.BlockSpec((4, kk, tm), lambda i: (0, 0, i)),
            pl.BlockSpec((cout, kk), lambda i: (0, 0)),
            pl.BlockSpec((cout, 1), lambda i: (0, 0)),
        ],
        out_specs=pl.BlockSpec((cout, tm), lambda i: (0, i)),
        compiler_params=pltpu.CompilerParams(
            dimension_semantics=("parallel",),
            vmem_limit_bytes=_VMEM_LIMIT,
        ),
    )(patches, wt, bias)
    return out.reshape(cout, bsz, ohp, owp)


def fc_head(h, w1, b1, w2, b2, w3, b3):
    """Fused fc1+ReLU+fc2+ReLU+fc3+softmax in a single pallas_call.
    h: (B, 256).  Weights stored as (in, out).  Returns (B, 10) f32 probs."""
    bsz, kin = h.shape
    n1, n2, n3 = w1.shape[1], w2.shape[1], w3.shape[1]
    tb = _pick_row_tile(bsz)
    grid = (bsz // tb,)
    return pl.pallas_call(
        _fc_softmax_kernel,
        out_shape=jax.ShapeDtypeStruct((bsz, n3), jnp.float32),
        grid=grid,
        in_specs=[
            pl.BlockSpec((tb, kin), lambda i: (i, 0)),
            pl.BlockSpec((kin, n1), lambda i: (0, 0)),
            pl.BlockSpec((1, n1), lambda i: (0, 0)),
            pl.BlockSpec((n1, n2), lambda i: (0, 0)),
            pl.BlockSpec((1, n2), lambda i: (0, 0)),
            pl.BlockSpec((n2, n3), lambda i: (0, 0)),
            pl.BlockSpec((1, n3), lambda i: (0, 0)),
        ],
        out_specs=pl.BlockSpec((tb, n3), lambda i: (i, 0)),
        compiler_params=pltpu.CompilerParams(
            dimension_semantics=("parallel",),
            vmem_limit_bytes=_VMEM_LIMIT,
        ),
    )(
        h.astype(jnp.bfloat16),
        w1.astype(jnp.bfloat16), b1.reshape(1, n1).astype(jnp.float32),
        w2.astype(jnp.bfloat16), b2.reshape(1, n2).astype(jnp.float32),
        w3.astype(jnp.bfloat16), b3.reshape(1, n3).astype(jnp.float32),
    )


# ------------------------------ model ---------------------------------------

def cnn_forward(params, x):
    """x: (B, 1, 28, 28) NCHW float32, like the torch module."""
    bsz = x.shape[0]
    # channel-major (Cin, B, H, W); with Cin=1 this transpose is a free reshape.
    a = jnp.transpose(x, (1, 0, 2, 3)).astype(jnp.bfloat16)
    a = conv_relu_pool(a, params["conv1_w"], params["conv1_b"])   # (6,  B, 12, 12)
    a = conv_relu_pool(a, params["conv2_w"], params["conv2_b"])   # (16, B,  4,  4)
    # single relayout at the classifier head so the flatten matches torch's
    # NCHW .view(B, 16*4*4) ordering (c, h, w)
    h = jnp.transpose(a, (1, 0, 2, 3)).reshape(bsz, 16 * 4 * 4)
    return fc_head(h, params["fc1_w"], params["fc1_b"],
                   params["fc2_w"], params["fc2_b"],
                   params["fc3_w"], params["fc3_b"])


def init_params(key):
    ks = jax.random.split(key, 10)

    def w_init(k, shape, fan_in):
        return jax.random.normal(k, shape, jnp.float32) / jnp.sqrt(jnp.float32(fan_in))

    def b_init(k, shape):
        return jax.random.normal(k, shape, jnp.float32) * 0.01

    return {
        # conv weights kept in torch layout (Cout, Cin, k, k)
        "conv1_w": w_init(ks[0], (6, 1, 5, 5), 1 * 5 * 5),
        "conv1_b": b_init(ks[1], (6,)),
        "conv2_w": w_init(ks[2], (16, 6, 5, 5), 6 * 5 * 5),
        "conv2_b": b_init(ks[3], (16,)),
        # fc weights stored as (in, out) so kernels compute x @ W + b
        "fc1_w": w_init(ks[4], (16 * 4 * 4, 120), 16 * 4 * 4),
        "fc1_b": b_init(ks[5], (120,)),
        "fc2_w": w_init(ks[6], (120, 84), 120),
        "fc2_b": b_init(ks[7], (84,)),
        "fc3_w": w_init(ks[8], (84, 10), 84),
        "fc3_b": b_init(ks[9], (10,)),
    }


if __name__ == "__main__":
    key = jax.random.PRNGKey(0)
    pkey, xkey = jax.random.split(key)
    params = init_params(pkey)
    # LeNet geometry requires 28x28 inputs: 28 -conv5-> 24 -pool-> 12 -conv5-> 8 -pool-> 4
    x = jax.random.normal(xkey, (2, 1, 28, 28), jnp.float32)

    out = jax.jit(cnn_forward)(params, x)
    out = jax.block_until_ready(out)

    assert out.shape == (2, 10)
    assert bool(jnp.all(jnp.isfinite(out)))
    # softmax rows sum to 1 (tolerance allows bf16 operands + approx reciprocal)
    assert bool(jnp.all(jnp.abs(jnp.sum(out, axis=1) - 1.0) < 1e-2))
    print("KERNEL_OK")
</pallas_src>

<mosaic_0001>
module attributes {stable_mosaic.version = 11 : i64} {
  func.func @_conv_relu_pool_kernel(%arg0: i32, %arg1: memref<4x25x288xbf16, #tpu.memory_space<vmem>>, %arg2: memref<6x25xbf16, #tpu.memory_space<vmem>>, %arg3: memref<6x1xf32, #tpu.memory_space<vmem>>, %arg4: memref<6x288xbf16, #tpu.memory_space<vmem>>) attributes {dimension_semantics = [#tpu.dimension_semantics<parallel>], iteration_bounds = array<i64: 1>, scalar_prefetch = 0 : i64, scratch_operands = 0 : i64, tpu.core_type = #tpu.core_type<tc>, window_params = [{transform_indices = @transform_0, window_bounds = array<i64: 4, 25, 288>}, {pipeline_mode = #tpu.pipeline_mode<synchronous>, transform_indices = @transform_1, window_bounds = array<i64: 6, 25>}, {pipeline_mode = #tpu.pipeline_mode<synchronous>, transform_indices = @transform_2, window_bounds = array<i64: 6, 1>}, {transform_indices = @transform_3, window_bounds = array<i64: 6, 288>}]} {
    %c0 = arith.constant 0 : index
    %c0_0 = arith.constant 0 : index
    %0 = vector.load %arg2[%c0, %c0_0] : memref<6x25xbf16, #tpu.memory_space<vmem>>, vector<6x25xbf16>
    %c0_1 = arith.constant 0 : index
    %c0_2 = arith.constant 0 : index
    %c0_3 = arith.constant 0 : index
    %1 = vector.load %arg1[%c0_1, %c0_2, %c0_3] : memref<4x25x288xbf16, #tpu.memory_space<vmem>>, vector<1x25x288xbf16>
    %2 = vector.shape_cast %1 : vector<1x25x288xbf16> to vector<25x288xbf16>
    %cst = arith.constant dense<0.000000e+00> : vector<6x288xf32>
    %3 = tpu.matmul %0, %2, %cst {dimension_numbers = #tpu.dot_dimension_numbers<[1], [0], [0], [1], [0, 0, 1, 1], [], []>} : vector<6x25xbf16>, vector<25x288xbf16>, vector<6x288xf32> -> vector<6x288xf32>
    %c1 = arith.constant 1 : index
    %c0_4 = arith.constant 0 : index
    %c0_5 = arith.constant 0 : index
    %4 = vector.load %arg1[%c1, %c0_4, %c0_5] : memref<4x25x288xbf16, #tpu.memory_space<vmem>>, vector<1x25x288xbf16>
    %5 = vector.shape_cast %4 : vector<1x25x288xbf16> to vector<25x288xbf16>
    %cst_6 = arith.constant dense<0.000000e+00> : vector<6x288xf32>
    %6 = tpu.matmul %0, %5, %cst_6 {dimension_numbers = #tpu.dot_dimension_numbers<[1], [0], [0], [1], [0, 0, 1, 1], [], []>} : vector<6x25xbf16>, vector<25x288xbf16>, vector<6x288xf32> -> vector<6x288xf32>
    %7 = arith.maximumf %3, %6 : vector<6x288xf32>
    %c2 = arith.constant 2 : index
    %c0_7 = arith.constant 0 : index
    %c0_8 = arith.constant 0 : index
    %8 = vector.load %arg1[%c2, %c0_7, %c0_8] : memref<4x25x288xbf16, #tpu.memory_space<vmem>>, vector<1x25x288xbf16>
    %9 = vector.shape_cast %8 : vector<1x25x288xbf16> to vector<25x288xbf16>
    %cst_9 = arith.constant dense<0.000000e+00> : vector<6x288xf32>
    %10 = tpu.matmul %0, %9, %cst_9 {dimension_numbers = #tpu.dot_dimension_numbers<[1], [0], [0], [1], [0, 0, 1, 1], [], []>} : vector<6x25xbf16>, vector<25x288xbf16>, vector<6x288xf32> -> vector<6x288xf32>
    %11 = arith.maximumf %7, %10 : vector<6x288xf32>
    %c3 = arith.constant 3 : index
    %c0_10 = arith.constant 0 : index
    %c0_11 = arith.constant 0 : index
    %12 = vector.load %arg1[%c3, %c0_10, %c0_11] : memref<4x25x288xbf16, #tpu.memory_space<vmem>>, vector<1x25x288xbf16>
    %13 = vector.shape_cast %12 : vector<1x25x288xbf16> to vector<25x288xbf16>
    %cst_12 = arith.constant dense<0.000000e+00> : vector<6x288xf32>
    %14 = tpu.matmul %0, %13, %cst_12 {dimension_numbers = #tpu.dot_dimension_numbers<[1], [0], [0], [1], [0, 0, 1, 1], [], []>} : vector<6x25xbf16>, vector<25x288xbf16>, vector<6x288xf32> -> vector<6x288xf32>
    %15 = arith.maximumf %11, %14 : vector<6x288xf32>
    %c0_13 = arith.constant 0 : index
    %c0_14 = arith.constant 0 : index
    %16 = vector.load %arg3[%c0_13, %c0_14] : memref<6x1xf32, #tpu.memory_space<vmem>>, vector<6x1xf32>
    %17 = vector.broadcast %16 : vector<6x1xf32> to vector<6x288xf32>
    %18 = arith.addf %15, %17 : vector<6x288xf32>
    %cst_15 = arith.constant 0.000000e+00 : f32
    %19 = vector.broadcast %cst_15 : f32 to vector<6x288xf32>
    %20 = arith.maximumf %18, %19 : vector<6x288xf32>
    %21 = arith.truncf %20 : vector<6x288xf32> to vector<6x288xbf16>
    %c0_16 = arith.constant 0 : index
    %c0_17 = arith.constant 0 : index
    %22 = vector.load %arg4[%c0_16, %c0_17] : memref<6x288xbf16, #tpu.memory_space<vmem>>, vector<6x288xbf16>
    tpu.vector_store %arg4[%c0_16, %c0_17], %21 {strides = array<i32>} : memref<6x288xbf16, #tpu.memory_space<vmem>>, vector<6x288xbf16>,
    return
  }
  func.func @transform_0(%arg0: i32) -> (i32, i32, i32) {
    %c0_i32 = arith.constant 0 : i32
    %c0_i32_0 = arith.constant 0 : i32
    %c0_i32_1 = arith.constant 0 : i32
    return %c0_i32, %c0_i32_0, %arg0 : i32, i32, i32
  }
  func.func @transform_1(%arg0: i32) -> (i32, i32) {
    %c0_i32 = arith.constant 0 : i32
    %c0_i32_0 = arith.constant 0 : i32
    %c0_i32_1 = arith.constant 0 : i32
    return %c0_i32, %c0_i32_0 : i32, i32
  }
  func.func @transform_2(%arg0: i32) -> (i32, i32) {
    %c0_i32 = arith.constant 0 : i32
    %c0_i32_0 = arith.constant 0 : i32
    %c0_i32_1 = arith.constant 0 : i32
    return %c0_i32, %c0_i32_0 : i32, i32
  }
  func.func @transform_3(%arg0: i32) -> (i32, i32) {
    %c0_i32 = arith.constant 0 : i32
    %c0_i32_0 = arith.constant 0 : i32
    return %c0_i32, %arg0 : i32, i32
  }
}

module attributes {stable_mosaic.version = 11 : i64} {
  func.func @_conv_relu_pool_kernel(%arg0: i32, %arg1: memref<4x150x32xbf16, #tpu.memory_space<vmem>>, %arg2: memref<16x150xbf16, #tpu.memory_space<vmem>>, %arg3: memref<16x1xf32, #tpu.memory_space<vmem>>, %arg4: memref<16x32xbf16, #tpu.memory_space<vmem>>) attributes {dimension_semantics = [#tpu.dimension_semantics<parallel>], iteration_bounds = array<i64: 1>, scalar_prefetch = 0 : i64, scratch_operands = 0 : i64, tpu.core_type = #tpu.core_type<tc>, window_params = [{transform_indices = @transform_0, window_bounds = array<i64: 4, 150, 32>}, {pipeline_mode = #tpu.pipeline_mode<synchronous>, transform_indices = @transform_1, window_bounds = array<i64: 16, 150>}, {pipeline_mode = #tpu.pipeline_mode<synchronous>, transform_indices = @transform_2, window_bounds = array<i64: 16, 1>}, {transform_indices = @transform_3, window_bounds = array<i64: 16, 32>}]} {
    %c0 = arith.constant 0 : index
    %c0_0 = arith.constant 0 : index
    %0 = vector.load %arg2[%c0, %c0_0] : memref<16x150xbf16, #tpu.memory_space<vmem>>, vector<16x150xbf16>
    %c0_1 = arith.constant 0 : index
    %c0_2 = arith.constant 0 : index
    %c0_3 = arith.constant 0 : index
    %1 = vector.load %arg1[%c0_1, %c0_2, %c0_3] : memref<4x150x32xbf16, #tpu.memory_space<vmem>>, vector<1x150x32xbf16>
    %2 = vector.shape_cast %1 : vector<1x150x32xbf16> to vector<150x32xbf16>
    %cst = arith.constant dense<0.000000e+00> : vector<16x32xf32>
    %3 = tpu.matmul %0, %2, %cst {dimension_numbers = #tpu.dot_dimension_numbers<[1], [0], [0], [1], [0, 0, 1, 1], [], []>} : vector<16x150xbf16>, vector<150x32xbf16>, vector<16x32xf32> -> vector<16x32xf32>
    %c1 = arith.constant 1 : index
    %c0_4 = arith.constant 0 : index
    %c0_5 = arith.constant 0 : index
    %4 = vector.load %arg1[%c1, %c0_4, %c0_5] : memref<4x150x32xbf16, #tpu.memory_space<vmem>>, vector<1x150x32xbf16>
    %5 = vector.shape_cast %4 : vector<1x150x32xbf16> to vector<150x32xbf16>
    %cst_6 = arith.constant dense<0.000000e+00> : vector<16x32xf32>
    %6 = tpu.matmul %0, %5, %cst_6 {dimension_numbers = #tpu.dot_dimension_numbers<[1], [0], [0], [1], [0, 0, 1, 1], [], []>} : vector<16x150xbf16>, vector<150x32xbf16>, vector<16x32xf32> -> vector<16x32xf32>
    %7 = arith.maximumf %3, %6 : vector<16x32xf32>
    %c2 = arith.constant 2 : index
    %c0_7 = arith.constant 0 : index
    %c0_8 = arith.constant 0 : index
    %8 = vector.load %arg1[%c2, %c0_7, %c0_8] : memref<4x150x32xbf16, #tpu.memory_space<vmem>>, vector<1x150x32xbf16>
    %9 = vector.shape_cast %8 : vector<1x150x32xbf16> to vector<150x32xbf16>
    %cst_9 = arith.constant dense<0.000000e+00> : vector<16x32xf32>
    %10 = tpu.matmul %0, %9, %cst_9 {dimension_numbers = #tpu.dot_dimension_numbers<[1], [0], [0], [1], [0, 0, 1, 1], [], []>} : vector<16x150xbf16>, vector<150x32xbf16>, vector<16x32xf32> -> vector<16x32xf32>
    %11 = arith.maximumf %7, %10 : vector<16x32xf32>
    %c3 = arith.constant 3 : index
    %c0_10 = arith.constant 0 : index
    %c0_11 = arith.constant 0 : index
    %12 = vector.load %arg1[%c3, %c0_10, %c0_11] : memref<4x150x32xbf16, #tpu.memory_space<vmem>>, vector<1x150x32xbf16>
    %13 = vector.shape_cast %12 : vector<1x150x32xbf16> to vector<150x32xbf16>
    %cst_12 = arith.constant dense<0.000000e+00> : vector<16x32xf32>
    %14 = tpu.matmul %0, %13, %cst_12 {dimension_numbers = #tpu.dot_dimension_numbers<[1], [0], [0], [1], [0, 0, 1, 1], [], []>} : vector<16x150xbf16>, vector<150x32xbf16>, vector<16x32xf32> -> vector<16x32xf32>
    %15 = arith.maximumf %11, %14 : vector<16x32xf32>
    %c0_13 = arith.constant 0 : index
    %c0_14 = arith.constant 0 : index
    %16 = vector.load %arg3[%c0_13, %c0_14] : memref<16x1xf32, #tpu.memory_space<vmem>>, vector<16x1xf32>
    %17 = vector.broadcast %16 : vector<16x1xf32> to vector<16x32xf32>
    %18 = arith.addf %15, %17 : vector<16x32xf32>
    %cst_15 = arith.constant 0.000000e+00 : f32
    %19 = vector.broadcast %cst_15 : f32 to vector<16x32xf32>
    %20 = arith.maximumf %18, %19 : vector<16x32xf32>
    %21 = arith.truncf %20 : vector<16x32xf32> to vector<16x32xbf16>
    %c0_16 = arith.constant 0 : index
    %c0_17 = arith.constant 0 : index
    %22 = vector.load %arg4[%c0_16, %c0_17] : memref<16x32xbf16, #tpu.memory_space<vmem>>, vector<16x32xbf16>
    tpu.vector_store %arg4[%c0_16, %c0_17], %21 {strides = array<i32>} : memref<16x32xbf16, #tpu.memory_space<vmem>>, vector<16x32xbf16>,
    return
  }
  func.func @transform_0(%arg0: i32) -> (i32, i32, i32) {
    %c0_i32 = arith.constant 0 : i32
    %c0_i32_0 = arith.constant 0 : i32
    %c0_i32_1 = arith.constant 0 : i32
    return %c0_i32, %c0_i32_0, %arg0 : i32, i32, i32
  }
  func.func @transform_1(%arg0: i32) -> (i32, i32) {
    %c0_i32 = arith.constant 0 : i32
    %c0_i32_0 = arith.constant 0 : i32
    %c0_i32_1 = arith.constant 0 : i32
    return %c0_i32, %c0_i32_0 : i32, i32
  }
  func.func @transform_2(%arg0: i32) -> (i32, i32) {
    %c0_i32 = arith.constant 0 : i32
    %c0_i32_0 = arith.constant 0 : i32
    %c0_i32_1 = arith.constant 0 : i32
    return %c0_i32, %c0_i32_0 : i32, i32
  }
  func.func @transform_3(%arg0: i32) -> (i32, i32) {
    %c0_i32 = arith.constant 0 : i32
    %c0_i32_0 = arith.constant 0 : i32
    return %c0_i32, %arg0 : i32, i32
  }
}

module attributes {stable_mosaic.version = 11 : i64} {
  func.func @_fc_softmax_kernel(%arg0: i32, %arg1: memref<2x256xbf16, #tpu.memory_space<vmem>>, %arg2: memref<256x120xbf16, #tpu.memory_space<vmem>>, %arg3: memref<1x120xf32, #tpu.memory_space<vmem>>, %arg4: memref<120x84xbf16, #tpu.memory_space<vmem>>, %arg5: memref<1x84xf32, #tpu.memory_space<vmem>>, %arg6: memref<84x10xbf16, #tpu.memory_space<vmem>>, %arg7: memref<1x10xf32, #tpu.memory_space<vmem>>, %arg8: memref<2x10xf32, #tpu.memory_space<vmem>>) attributes {dimension_semantics = [#tpu.dimension_semantics<parallel>], iteration_bounds = array<i64: 1>, scalar_prefetch = 0 : i64, scratch_operands = 0 : i64, tpu.core_type = #tpu.core_type<tc>, window_params = [{transform_indices = @transform_0, window_bounds = array<i64: 2, 256>}, {pipeline_mode = #tpu.pipeline_mode<synchronous>, transform_indices = @transform_1, window_bounds = array<i64: 256, 120>}, {pipeline_mode = #tpu.pipeline_mode<synchronous>, transform_indices = @transform_2, window_bounds = array<i64: 1, 120>}, {pipeline_mode = #tpu.pipeline_mode<synchronous>, transform_indices = @transform_3, window_bounds = array<i64: 120, 84>}, {pipeline_mode = #tpu.pipeline_mode<synchronous>, transform_indices = @transform_4, window_bounds = array<i64: 1, 84>}, {pipeline_mode = #tpu.pipeline_mode<synchronous>, transform_indices = @transform_5, window_bounds = array<i64: 84, 10>}, {pipeline_mode = #tpu.pipeline_mode<synchronous>, transform_indices = @transform_6, window_bounds = array<i64: 1, 10>}, {transform_indices = @transform_7, window_bounds = array<i64: 2, 10>}]} {
    %c0 = arith.constant 0 : index
    %c0_0 = arith.constant 0 : index
    %0 = vector.load %arg1[%c0, %c0_0] : memref<2x256xbf16, #tpu.memory_space<vmem>>, vector<2x256xbf16>
    %c0_1 = arith.constant 0 : index
    %c0_2 = arith.constant 0 : index
    %1 = vector.load %arg2[%c0_1, %c0_2] : memref<256x120xbf16, #tpu.memory_space<vmem>>, vector<256x120xbf16>
    %cst = arith.constant dense<0.000000e+00> : vector<2x120xf32>
    %2 = tpu.matmul %0, %1, %cst {dimension_numbers = #tpu.dot_dimension_numbers<[1], [0], [0], [1], [0, 0, 1, 1], [], []>} : vector<2x256xbf16>, vector<256x120xbf16>, vector<2x120xf32> -> vector<2x120xf32>
    %c0_3 = arith.constant 0 : index
    %c0_4 = arith.constant 0 : index
    %3 = vector.load %arg3[%c0_3, %c0_4] : memref<1x120xf32, #tpu.memory_space<vmem>>, vector<1x120xf32>
    %4 = vector.broadcast %3 : vector<1x120xf32> to vector<2x120xf32>
    %5 = arith.addf %2, %4 : vector<2x120xf32>
    %cst_5 = arith.constant 0.000000e+00 : f32
    %6 = vector.broadcast %cst_5 : f32 to vector<2x120xf32>
    %7 = arith.maximumf %5, %6 : vector<2x120xf32>
    %8 = arith.truncf %7 : vector<2x120xf32> to vector<2x120xbf16>
    %c0_6 = arith.constant 0 : index
    %c0_7 = arith.constant 0 : index
    %9 = vector.load %arg4[%c0_6, %c0_7] : memref<120x84xbf16, #tpu.memory_space<vmem>>, vector<120x84xbf16>
    %cst_8 = arith.constant dense<0.000000e+00> : vector<2x84xf32>
    %10 = tpu.matmul %8, %9, %cst_8 {dimension_numbers = #tpu.dot_dimension_numbers<[1], [0], [0], [1], [0, 0, 1, 1], [], []>} : vector<2x120xbf16>, vector<120x84xbf16>, vector<2x84xf32> -> vector<2x84xf32>
    %c0_9 = arith.constant 0 : index
    %c0_10 = arith.constant 0 : index
    %11 = vector.load %arg5[%c0_9, %c0_10] : memref<1x84xf32, #tpu.memory_space<vmem>>, vector<1x84xf32>
    %12 = vector.broadcast %11 : vector<1x84xf32> to vector<2x84xf32>
    %13 = arith.addf %10, %12 : vector<2x84xf32>
    %cst_11 = arith.constant 0.000000e+00 : f32
    %14 = vector.broadcast %cst_11 : f32 to vector<2x84xf32>
    %15 = arith.maximumf %13, %14 : vector<2x84xf32>
    %16 = arith.truncf %15 : vector<2x84xf32> to vector<2x84xbf16>
    %c0_12 = arith.constant 0 : index
    %c0_13 = arith.constant 0 : index
    %17 = vector.load %arg6[%c0_12, %c0_13] : memref<84x10xbf16, #tpu.memory_space<vmem>>, vector<84x10xbf16>
    %cst_14 = arith.constant dense<0.000000e+00> : vector<2x10xf32>
    %18 = tpu.matmul %16, %17, %cst_14 {dimension_numbers = #tpu.dot_dimension_numbers<[1], [0], [0], [1], [0, 0, 1, 1], [], []>} : vector<2x84xbf16>, vector<84x10xbf16>, vector<2x10xf32> -> vector<2x10xf32>
    %c0_15 = arith.constant 0 : index
    %c0_16 = arith.constant 0 : index
    %19 = vector.load %arg7[%c0_15, %c0_16] : memref<1x10xf32, #tpu.memory_space<vmem>>, vector<1x10xf32>
    %20 = vector.broadcast %19 : vector<1x10xf32> to vector<2x10xf32>
    %21 = arith.addf %18, %20 : vector<2x10xf32>
    %cst_17 = arith.constant dense<0xFF800000> : vector<2xf32>
    %22 = vector.multi_reduction <maximumf>, %21, %cst_17 [1] : vector<2x10xf32> to vector<2xf32>
    %23 = vector.shape_cast %22 : vector<2xf32> to vector<2x1xf32>
    %24 = vector.broadcast %23 : vector<2x1xf32> to vector<2x10xf32>
    %25 = arith.subf %21, %24 : vector<2x10xf32>
    %26 = math.exp %25 : vector<2x10xf32>
    %cst_18 = arith.constant dense<0.000000e+00> : vector<2xf32>
    %27 = vector.multi_reduction <add>, %26, %cst_18 [1] : vector<2x10xf32> to vector<2xf32>
    %28 = vector.shape_cast %27 : vector<2xf32> to vector<2x1xf32>
    %29 = tpu.reciprocal %28 {approx = true} : vector<2x1xf32> -> vector<2x1xf32>
    %30 = vector.broadcast %29 : vector<2x1xf32> to vector<2x10xf32>
    %31 = arith.mulf %26, %30 : vector<2x10xf32>
    %c0_19 = arith.constant 0 : index
    %c0_20 = arith.constant 0 : index
    %32 = vector.load %arg8[%c0_19, %c0_20] : memref<2x10xf32, #tpu.memory_space<vmem>>, vector<2x10xf32>
    tpu.vector_store %arg8[%c0_19, %c0_20], %31 {strides = array<i32>} : memref<2x10xf32, #tpu.memory_space<vmem>>, vector<2x10xf32>,
    return
  }
  func.func @transform_0(%arg0: i32) -> (i32, i32) {
    %c0_i32 = arith.constant 0 : i32
    %c0_i32_0 = arith.constant 0 : i32
    return %arg0, %c0_i32 : i32, i32
  }
  func.func @transform_1(%arg0: i32) -> (i32, i32) {
    %c0_i32 = arith.constant 0 : i32
    %c0_i32_0 = arith.constant 0 : i32
    %c0_i32_1 = arith.constant 0 : i32
    return %c0_i32, %c0_i32_0 : i32, i32
  }
  func.func @transform_2(%arg0: i32) -> (i32, i32) {
    %c0_i32 = arith.constant 0 : i32
    %c0_i32_0 = arith.constant 0 : i32
    %c0_i32_1 = arith.constant 0 : i32
    return %c0_i32, %c0_i32_0 : i32, i32
  }
  func.func @transform_3(%arg0: i32) -> (i32, i32) {
    %c0_i32 = arith.constant 0 : i32
    %c0_i32_0 = arith.constant 0 : i32
    %c0_i32_1 = arith.constant 0 : i32
    return %c0_i32, %c0_i32_0 : i32, i32
  }
  func.func @transform_4(%arg0: i32) -> (i32, i32) {
    %c0_i32 = arith.constant 0 : i32
    %c0_i32_0 = arith.constant 0 : i32
    %c0_i32_1 = arith.constant 0 : i32
    return %c0_i32, %c0_i32_0 : i32, i32
  }
  func.func @transform_5(%arg0: i32) -> (i32, i32) {
    %c0_i32 = arith.constant 0 : i32
    %c0_i32_0 = arith.constant 0 : i32
    %c0_i32_1 = arith.constant 0 : i32
    return %c0_i32, %c0_i32_0 : i32, i32
  }
  func.func @transform_6(%arg0: i32) -> (i32, i32) {
    %c0_i32 = arith.constant 0 : i32
    %c0_i32_0 = arith.constant 0 : i32
    %c0_i32_1 = arith.constant 0 : i32
    return %c0_i32, %c0_i32_0 : i32, i32
  }
  func.func @transform_7(%arg0: i32) -> (i32, i32) {
    %c0_i32 = arith.constant 0 : i32
    %c0_i32_0 = arith.constant 0 : i32
    return %arg0, %c0_i32 : i32, i32
  }
}

</mosaic_0001>

<bundles_post_ra>
// kernel: cnn_forward.3
= control target key start
LH: loop header
LB: loop body
LE: loop exit
PB: predicated region body
PF: predicated region fallthrough
CT: control target
= control target key end

     0   :  { %vm57_vm0 = vcmask 1043456   ;;  %vm58_vm1 = vcmask 1044480   ;;  %v717_v0 = vmov 0.0   ;;  %v718_v2 = vmov 65535   ;;  %s878_s0 = inlined_call_operand.vmem [shape: bf16[4,25,288], index: 0, kind: input, shape index: {}]   ;;  %s879_s1 = inlined_call_operand.vmem [shape: bf16[6,25], index: 1, kind: input, shape index: {}]   ;;  %s880_s2 = inlined_call_operand.vmem [shape: f32[6,1], index: 2, kind: input, shape index: {}]   ;;  %s881_s3 = inlined_call_operand.vmem [shape: bf16[6,288], index: 3, kind: output, shape index: {}]  }
   0x1   :  { %648 = vmatprep.subr.bf16.mxu1 %v717_v0  ;;  %v685_v1 = vld [vmem:[%s878_s0 + $0x1c] ss:$12 sps:$4 sm:$0x1f]   ;;  %v59_v3 = vsel %vm57_vm0, 4294967295, %v718_v2  ;;  %vm719_vm2 = vmmov 0   ;;  %v720_v10 = vmov 0  }
   0x2   :  { %v745_v4 = vsel %vm58_vm1, %v59_v3, 0  ;;  %v687_v5 = vld [vmem:[%s878_s0 + $0x20] ss:$12 sps:$4 sm:$0x1f]   ;;  %652 = vmatprep.mubr.msk.bf16.mxu1 %vm719_vm2, %v717_v0  ;;  %v689_v9 = vld [vmem:[%s878_s0 + $0x4] ss:$12 sps:$4 sm:$0xff]   ;;  %102 = vmatprep.mubr.bf16.mxu0 %v720_v10 }
   0x3   :  { %v65_v6 = vand.u32 %v685_v1, %v745_v4  ;;  %v688_v7 = vld [vmem:[%s878_s0 + $0x18] ss:$12 sps:$4 sm:$0x1f]   ;;  %v68_v8 = vand.u32 %v687_v5, %v745_v4  ;;  %684 = vset.pattern.permute.xlu0 %v720_v10  ;;  %v691_v12 = vld [vmem:[%s878_s0 + $0x8] ss:$12 sps:$4 sm:$0xff]   ;;  %vm53_vm3 = vcmask 203776  }
   0x4   :  { %v62_v11 = vand.u32 %v688_v7, %v745_v4  ;;  %v692_v13 = vld [vmem:[%s878_s0] ss:$12 sps:$4 sm:$0xff]   ;;  %v693_v14 = vld [vmem:[%s878_s0 + $0x48] ss:$12 sps:$4 sm:$0x1f]   ;;  %vm570_vm4 = vcmask 256000  }
   0x5   :  { %82 = vmatprep.subr.bf16.mxu0 %v65_v6  ;;  %649 = vmatpush3.bf16.msra.mxu1 %v68_v8  ;;  %v695_v15 = vld [vmem:[%s878_s0 + $0x4c] ss:$12 sps:$4 sm:$0x1f]   ;;  %v696_v16 = vld [vmem:[%s878_s0 + $0x50] ss:$12 sps:$4 sm:$0x1f]   ;;  %v190_v20 = vand.u32 %v693_v14, %v745_v4 }
   0x6   :  { %83 = vmatpush1.bf16.msra.mxu0 %v62_v11  ;;  %650 = vmatprep.subr.bf16.mxu1 %v717_v0  ;;  %v782_v17 = vld [vmem:[%s879_s1] sm:$0x7]  ;;  %v193_v18 = vand.u32 %v695_v15, %v745_v4  ;;  %v196_v19 = vand.u32 %v696_v16, %v745_v4  ;;  %v703_v22 = vld [vmem:[%s878_s0 + $0x7c] ss:$12 sps:$4 sm:$0x1f]  }
   0x7   :  { %84 = vmatprep.subr.bf16.mxu0 %v689_v9  ;;  %v699_v21 = vld [vmem:[%s878_s0 + $0x34] ss:$12 sps:$4 sm:$0xff]   ;;  %v697_v23 = vld [vmem:[%s878_s0 + $0x30] ss:$12 sps:$4 sm:$0xff]   ;;  %v700_v25 = vld [vmem:[%s878_s0 + $0x38] ss:$12 sps:$4 sm:$0xff]   ;;  %v324_v27 = vand.u32 %v703_v22, %v745_v4 }
   0x8   :  { %v704_v24 = vld [vmem:[%s878_s0 + $0x80] ss:$12 sps:$4 sm:$0x1f]   ;;  %v701_v26 = vld [vmem:[%s878_s0 + $0x78] ss:$12 sps:$4 sm:$0x1f]  }
   0x9   :  { %651 = vmatpush3.bf16.msra.mxu1 %v691_v12  ;;  %v327_v28 = vand.u32 %v704_v24, %v745_v4  ;;  %v321_v29 = vand.u32 %v701_v26, %v745_v4  ;;  %v707_v30 = vld [vmem:[%s878_s0 + $0x64] ss:$12 sps:$4 sm:$0xff]   ;;  %v711_v31 = vld [vmem:[%s878_s0 + $0xac] ss:$12 sps:$4 sm:$0x1f]  }
   0xa   :  { %85 = vmatpush1.bf16.msra.mxu0 %v692_v13  ;;  %656 = vmatprep.subr.bf16.mxu1 %v717_v0  ;;  %v544_v32 = vld [vmem:[%s880_s2] sm:$0x3f]  ;;  %v708_v33 = vld [vmem:[%s878_s0 + $0x68] ss:$12 sps:$4 sm:$0xff]   ;;  %v455_v37 = vand.u32 %v711_v31, %v745_v4  ;;  %v713_v42 = vld [vmem:[%s878_s0 + $0x90] ss:$12 sps:$4 sm:$0xff]  }
   0xb   :  { %210 = vmatprep.subr.bf16.mxu0 %v193_v18  ;;  %547 = vperm.xlu0 %684, %v544_v32   ;;  %v712_v34 = vld [vmem:[%s878_s0 + $0xb0] ss:$12 sps:$4 sm:$0x1f]   ;;  %v705_v35 = vld [vmem:[%s878_s0 + $0x60] ss:$12 sps:$4 sm:$0xff]  }
   0xc   :  { %653 = vmatmul.mubr.msk.bf16.vlgmr.msra.gmra.mxu1 %vm53_vm3, %v782_v17  ;;  %v709_v36 = vld [vmem:[%s878_s0 + $0xa8] ss:$12 sps:$4 sm:$0x1f]   ;;  %v458_v38 = vand.u32 %v712_v34, %v745_v4  ;;  %v716_v41 = vld [vmem:[%s878_s0 + $0x98] ss:$12 sps:$4 sm:$0xff]  }
   0xd   :  { %582 = vmatmul.mubr.msk.bf16.vlgmr.msra.gmra.mxu0 %vm53_vm3, %v782_v17  ;;  %657 = vmatpush3.bf16.msra.mxu1 %v196_v19  ;;  %v452_v39 = vand.u32 %v709_v36, %v745_v4  ;;  %v715_v40 = vld [vmem:[%s878_s0 + $0x94] ss:$12 sps:$4 sm:$0xff]  }
   0xe   :  { %211 = vmatpush1.bf16.msra.mxu0 %v190_v20  ;;  %658 = vmatprep.subr.bf16.mxu1 %v717_v0 }
   0xf   :  { %212 = vmatprep.subr.bf16.mxu0 %v699_v21  ;;  %660 = vmatprep.mubr.msk.bf16.mxu1 %vm719_vm2, %v717_v0 }
  0x10   :  { %230 = vmatprep.mubr.bf16.mxu0 %v720_v10 }
  0x11   :  { %659 = vmatpush3.bf16.msra.mxu1 %v700_v25 }
  0x12   :  { %213 = vmatpush1.bf16.msra.mxu0 %v697_v23  ;;  %664 = vmatprep.subr.bf16.mxu1 %v717_v0 }
  0x13   :  { %341 = vmatprep.subr.bf16.mxu0 %v324_v27 }
  0x14   :  { %661 = vmatmul.mubr.msk.bf16.vlgmr.msra.gmra.mxu1 %vm53_vm3, %v782_v17 }
  0x15   :  { %598 = vmatmul.mubr.msk.bf16.vlgmr.msra.gmra.mxu0 %vm53_vm3, %v782_v17  ;;  %665 = vmatpush3.bf16.msra.mxu1 %v327_v28 }
  0x16   :  { %342 = vmatpush1.bf16.msra.mxu0 %v321_v29  ;;  %666 = vmatprep.subr.bf16.mxu1 %v717_v0 }
  0x17   :  { %343 = vmatprep.subr.bf16.mxu0 %v707_v30  ;;  %668 = vmatprep.mubr.msk.bf16.mxu1 %vm719_vm2, %v717_v0 }
  0x18   :  { %361 = vmatprep.mubr.bf16.mxu0 %v720_v10 }
  0x19   :  { %667 = vmatpush3.bf16.msra.mxu1 %v708_v33 }
  0x1a   :  { %344 = vmatpush1.bf16.msra.mxu0 %v705_v35  ;;  %672 = vmatprep.subr.bf16.mxu1 %v717_v0 }
  0x1b   :  { %472 = vmatprep.subr.bf16.mxu0 %v455_v37 }
  0x1c   :  { %669 = vmatmul.mubr.msk.bf16.vlgmr.msra.gmra.mxu1 %vm53_vm3, %v782_v17 }
  0x1d   :  { %614 = vmatmul.mubr.msk.bf16.vlgmr.msra.gmra.mxu0 %vm53_vm3, %v782_v17  ;;  %673 = vmatpush3.bf16.msra.mxu1 %v458_v38 }
  0x1e   :  { %473 = vmatpush1.bf16.msra.mxu0 %v452_v39  ;;  %674 = vmatprep.subr.bf16.mxu1 %v717_v0 }
  0x1f   :  { %474 = vmatprep.subr.bf16.mxu0 %v715_v40  ;;  %676 = vmatprep.mubr.msk.bf16.mxu1 %vm719_vm2, %v717_v0 }
  0x20   :  { %492 = vmatprep.mubr.bf16.mxu0 %v720_v10 }
  0x21   :  { %675 = vmatpush3.bf16.msra.mxu1 %v716_v41 }
  0x22   :  { %475 = vmatpush1.bf16.msra.mxu0 %v713_v42 }
  0x24   :  { %677 = vmatmul.mubr.msk.bf16.vlgmr.msra.gmra.mxu1 %vm53_vm3, %v782_v17 }
  0x25   :  { %630 = vmatmul.mubr.msk.bf16.vlgmr.msra.gmra.mxu0 %vm53_vm3, %v782_v17 }
  0x86   :  { %v548_v9 = vpop.permute.xlu0 %547 }
  0xcc   :  { %v145_v43 = vpop.f32.mrf.mxu1 }
  0xcd   :  { %v104_v44 = vpop.f32.mrf.mxu0 }
  0xce   :  { %v654_v45 = vpop.f32.mrf.mxu1 }
  0xcf   :  { %v106_v46 = vpop.f32.mrf.mxu0 }
  0xd0   :  { %v148_v47 = vpop.f32.mrf.mxu1 }
  0xd1   :  { %v108_v48 = vpop.f32.mrf.mxu0 }
  0xd2   :  { %v655_v49 = vpop.f32.mrf.mxu1 }
  0xd3   :  { %v109_v50 = vpop.f32.mrf.mxu0 }
  0xd4   :  { %v273_v51 = vpop.f32.mrf.mxu1 }
  0xd5   :  { %v232_v52 = vpop.f32.mrf.mxu0  ;;  %v281_v0 = vmax.f32 %v145_v43, %v273_v51 }
  0xd6   :  { %v662_v53 = vpop.f32.mrf.mxu1  ;;  %v279_v2 = vmax.f32 %v104_v44, %v232_v52 }
  0xd7   :  { %v234_v54 = vpop.f32.mrf.mxu0 }
  0xd8   :  { %v276_v55 = vpop.f32.mrf.mxu1  ;;  %v280_v6 = vmax.f32 %v106_v46, %v234_v54 }
  0xd9   :  { %v236_v56 = vpop.f32.mrf.mxu0 }
  0xda   :  { %v663_v57 = vpop.f32.mrf.mxu1 }
  0xdb   :  { %v237_v58 = vpop.f32.mrf.mxu0 }
  0xdc   :  { %v404_v59 = vpop.f32.mrf.mxu1 }
  0xdd   :  { %v363_v60 = vpop.f32.mrf.mxu0  ;;  %v412_v4 = vmax.f32 %v281_v0, %v404_v59 }
  0xde   :  { %v670_v61 = vpop.f32.mrf.mxu1  ;;  %v410_v7 = vmax.f32 %v279_v2, %v363_v60 }
  0xdf   :  { %v365_v62 = vpop.f32.mrf.mxu0 }
  0xe0   :  { %v407_v63 = vpop.f32.mrf.mxu1  ;;  %v411_v12 = vmax.f32 %v280_v6, %v365_v62 }
  0xe1   :  { %v367_v1 = vpop.f32.mrf.mxu0 }
  0xe2   :  { %v671_v3 = vpop.f32.mrf.mxu1 }
  0xe3   :  { %v368_v5 = vpop.f32.mrf.mxu0 }
  0xe4   :  { %v535_v8 = vpop.f32.mrf.mxu1 }
  0xe5   :  { %v543_v10 = vmax.f32 %v412_v4, %v535_v8  ;;  %v494_v11 = vpop.f32.mrf.mxu0 }
  0xe6   :  { %v541_v13 = vmax.f32 %v410_v7, %v494_v11  ;;  %v678_v14 = vpop.f32.mrf.mxu1 }
  0xe7   :  { %v552_v15 = vadd.f32 %v548_v9, %v543_v10  ;;  %v496_v16 = vpop.f32.mrf.mxu0 }
  0xe8   :  { %v550_v17 = vadd.f32 %v548_v9, %v541_v13  ;;  %v542_v18 = vmax.f32 %v411_v12, %v496_v16  ;;  %v538_v19 = vpop.f32.mrf.mxu1 }
  0xe9   :  { %v555_v20 = vmax.f32 %v552_v15, 0.0  ;;  %v498_v21 = vpop.f32.mrf.mxu0 }
  0xea   :  { %v551_v22 = vadd.f32 %v548_v9, %v542_v18  ;;  %v679_v23 = vpop.f32.mrf.mxu1  ;;  %v553_v26 = vmax.f32 %v550_v17, 0.0 }
  0xeb   :  { %v635_v24 = vpack.c.bf16 %v555_v20, %v555_v20  ;;  %v499_v25 = vpop.f32.mrf.mxu0 }
  0xec   :  { %v554_v27 = vmax.f32 %v551_v22, 0.0 }
  0xed   :  { %571 = vst.msk [vmem:[%s881_s3 + $0x8] sm:$0x7] %vm570_vm4, %v635_v24 }
  0xee   :  { %v634_v28 = vpack.c.bf16 %v554_v27, %v553_v26 }
  0xf0   :  { %569 = vst [vmem:[%s881_s3] sm:$0x77] %v634_v28 }

// kernel: cnn_forward.4
= control target key start
LH: loop header
LB: loop body
LE: loop exit
PB: predicated region body
PF: predicated region fallthrough
CT: control target
= control target key end

     0   :  { %v703_v0 = vmov 0   ;;  %vm102_vm0 = vcmask 179200   ;;  %vm106_vm1 = vcmask 1042432   ;;  %vm544_vm2 = vcmask 257024   ;;  %s917_s0 = inlined_call_operand.vmem [shape: bf16[4,150,32], index: 0, kind: input, shape index: {}]   ;;  %s918_s1 = inlined_call_operand.vmem [shape: bf16[16,150], index: 1, kind: input, shape index: {}]   ;;  %s919_s2 = inlined_call_operand.vmem [shape: f32[16,1], index: 2, kind: input, shape index: {}]   ;;  %s920_s3 = inlined_call_operand.vmem [shape: bf16[16,32], index: 3, kind: output, shape index: {}]  }
   0x1   :  { %110 = vmatprep.subr.bf16.mxu0 %v703_v0  ;;  %231 = vmatprep.subr.bf16.mxu1 %v703_v0  ;;  %v660_v1 = vld [vmem:[%s917_s0 + $0x38] sm:$0xff]   ;;  %v661_v2 = vld [vmem:[%s917_s0 + $0x84] sm:$0xff]   ;;  %v662_v3 = vld [vmem:[%s917_s0 + $0x30] sm:$0xff]  }
   0x2   :  { %659 = vset.pattern.permute.xlu0 %v703_v0  ;;  %111 = vmatpush1.bf16.msra.mxu0 %v660_v1  ;;  %v663_v4 = vld [vmem:[%s917_s0 + $0x7c] sm:$0xff]   ;;  %v664_v5 = vld [vmem:[%s917_s0 + $0x28] sm:$0xff]   ;;  %v665_v6 = vld [vmem:[%s917_s0 + $0x74] sm:$0xff]  }
   0x3   :  { %232 = vmatpush1.bf16.msra.mxu1 %v661_v2  ;;  %112 = vmatprep.subr.bf16.mxu0 %v703_v0  ;;  %v666_v7 = vld [vmem:[%s917_s0 + $0x20] sm:$0xff]   ;;  %v667_v8 = vld [vmem:[%s917_s0 + $0x6c] sm:$0xff]   ;;  %v668_v9 = vld [vmem:[%s917_s0 + $0x18] sm:$0xff]  }
   0x4   :  { %233 = vmatprep.subr.bf16.mxu1 %v703_v0  ;;  %v669_v10 = vld [vmem:[%s917_s0 + $0x64] sm:$0xff]   ;;  %v670_v11 = vld [vmem:[%s917_s0 + $0x10] sm:$0xff]   ;;  %v671_v12 = vld [vmem:[%s917_s0 + $0x5c] sm:$0xff]  }
   0x5   :  { %v680_v13 = vld [vmem:[%s918_s1 + $0x4] ss:$8 sps:$4 sm:$0xff]   ;;  %v673_v15 = vld [vmem:[%s917_s0 + $0x54] sm:$0xff]   ;;  %v676_v16 = vld [vmem:[%s917_s0 + $0x48] ss:$0 sps:$4 sm:$0x77]  }
   0x6   :  { %113 = vmatpush1.bf16.msra.mxu0 %v662_v3  ;;  %v672_v14 = vld [vmem:[%s917_s0 + $0x8] sm:$0xff]   ;;  %563 = vmatprep.mubr.msk.bf16.mxu0 %vm102_vm0, %v680_v13  ;;  %v674_v17 = vld [vmem:[%s917_s0] sm:$0xff]   ;;  %v677_v18 = vld [vmem:[%s917_s0 + $0x94] ss:$0 sps:$4 sm:$0x77]   ;;  %v108_v20 = vsel %vm106_vm1, %v676_v16, 0 }
   0x7   :  { %234 = vmatpush1.bf16.msra.mxu1 %v663_v4  ;;  %114 = vmatprep.subr.bf16.mxu0 %v703_v0  ;;  %v675_v19 = vld [vmem:[%s917_s0 + $0x4c] sm:$0xff]   ;;  %v229_v21 = vsel %vm106_vm1, %v677_v18, 0  ;;  %v678_v22 = vld [vmem:[%s917_s0 + $0x40] sm:$0xff]   ;;  %v686_v30 = vld [vmem:[%s917_s0 + $0x114] sm:$0xff]  }
   0x8   :  { %235 = vmatprep.subr.bf16.mxu1 %v703_v0  ;;  %593 = vmatprep.mubr.msk.bf16.mxu1 %vm102_vm0, %v680_v13  ;;  %v679_v23 = vld [vmem:[%s917_s0 + $0x8c] sm:$0xff]   ;;  %v815_v24 = vld [vmem:[%s918_s1] ss:$8 sps:$4 sm:$0xff]   ;;  %v689_v33 = vld [vmem:[%s917_s0 + $0xb8] sm:$0xff]  }
   0x9   :  { %v683_v25 = vld [vmem:[%s917_s0 + $0xd0] sm:$0xff]   ;;  %v684_v26 = vld [vmem:[%s917_s0 + $0x11c] sm:$0xff]   ;;  %v685_v28 = vld [vmem:[%s917_s0 + $0xc8] sm:$0xff]  }
   0xa   :  { %115 = vmatpush1.bf16.msra.mxu0 %v664_v5  ;;  %v520_v27 = vld [vmem:[%s919_s2] sm:$0xff]  ;;  %v521_v29 = vld [vmem:[%s919_s2 + $0x8] sm:$0xff]  ;;  %v691_v35 = vld [vmem:[%s917_s0 + $0xb0] sm:$0xff]  }
   0xb   :  { %236 = vmatpush1.bf16.msra.mxu1 %v665_v6  ;;  %116 = vmatprep.subr.bf16.mxu0 %v703_v0  ;;  %v687_v31 = vld [vmem:[%s917_s0 + $0xc0] sm:$0xff]   ;;  %v688_v32 = vld [vmem:[%s917_s0 + $0x10c] sm:$0xff]   ;;  %v694_v38 = vld [vmem:[%s917_s0 + $0xf4] sm:$0xff]  }
   0xc   :  { %237 = vmatprep.subr.bf16.mxu1 %v703_v0  ;;  %524 = vperm.xlu0 %659, %v520_v27   ;;  %v690_v34 = vld [vmem:[%s917_s0 + $0x104] sm:$0xff]   ;;  %v692_v36 = vld [vmem:[%s917_s0 + $0xfc] sm:$0xff]   ;;  %v696_v40 = vld [vmem:[%s917_s0 + $0xec] sm:$0xff]  }
   0xd   :  { %v693_v37 = vld [vmem:[%s917_s0 + $0xa8] sm:$0xff]   ;;  %v695_v39 = vld [vmem:[%s917_s0 + $0xa0] sm:$0xff]   ;;  %v697_v41 = vld [vmem:[%s917_s0 + $0x98] sm:$0xff]  }
   0xe   :  { %117 = vmatpush1.bf16.msra.mxu0 %v666_v7  ;;  %v698_v42 = vld [vmem:[%s917_s0 + $0xe4] sm:$0xff]   ;;  %v699_v43 = vld [vmem:[%s917_s0 + $0xe0] ss:$0 sps:$4 sm:$0x77]   ;;  %v701_v47 = vld [vmem:[%s917_s0 + $0xd8] sm:$0xff]  }
   0xf   :  { %238 = vmatpush1.bf16.msra.mxu1 %v667_v8  ;;  %118 = vmatprep.subr.bf16.mxu0 %v703_v0  ;;  %v700_v44 = vld [vmem:[%s917_s0 + $0x12c] ss:$0 sps:$4 sm:$0x77]   ;;  %v352_v45 = vsel %vm106_vm1, %v699_v43, 0  ;;  %v702_v48 = vld [vmem:[%s917_s0 + $0x124] sm:$0xff]  }
  0x10   :  { %239 = vmatprep.subr.bf16.mxu1 %v703_v0  ;;  %529 = vperm.xlu0 %659, %v521_v29   ;;  %v475_v46 = vsel %vm106_vm1, %v700_v44, 0 }
  0x12   :  { %119 = vmatpush1.bf16.msra.mxu0 %v668_v9 }
  0x13   :  { %240 = vmatpush1.bf16.msra.mxu1 %v669_v10  ;;  %120 = vmatprep.subr.bf16.mxu0 %v703_v0 }
  0x14   :  { %241 = vmatprep.subr.bf16.mxu1 %v703_v0 }
  0x16   :  { %121 = vmatpush1.bf16.msra.mxu0 %v670_v11 }
  0x17   :  { %242 = vmatpush1.bf16.msra.mxu1 %v671_v12  ;;  %122 = vmatprep.subr.bf16.mxu0 %v703_v0 }
  0x18   :  { %243 = vmatprep.subr.bf16.mxu1 %v703_v0 }
  0x1a   :  { %123 = vmatpush1.bf16.msra.mxu0 %v672_v14 }
  0x1b   :  { %244 = vmatpush1.bf16.msra.mxu1 %v673_v15  ;;  %124 = vmatprep.subr.bf16.mxu0 %v703_v0 }
  0x1c   :  { %245 = vmatprep.subr.bf16.mxu1 %v703_v0 }
  0x1e   :  { %125 = vmatpush1.bf16.msra.mxu0 %v674_v17 }
  0x1f   :  { %246 = vmatpush1.bf16.msra.mxu1 %v675_v19  ;;  %138 = vmatprep.subr.bf16.mxu0 %v703_v0 }
  0x20   :  { %259 = vmatprep.subr.bf16.mxu1 %v703_v0 }
  0x22   :  { %139 = vmatpush2.bf16.msra.mxu0 %v108_v20 }
  0x23   :  { %260 = vmatpush2.bf16.msra.mxu1 %v229_v21  ;;  %140 = vmatprep.subr.bf16.mxu0 %v703_v0 }
  0x24   :  { %261 = vmatprep.subr.bf16.mxu1 %v703_v0 }
  0x26   :  { %141 = vmatpush2.bf16.msra.mxu0 %v678_v22 }
  0x27   :  { %262 = vmatpush2.bf16.msra.mxu1 %v679_v23  ;;  %354 = vmatprep.subr.bf16.mxu0 %v703_v0 }
  0x28   :  { %477 = vmatprep.subr.bf16.mxu1 %v703_v0 }
  0x29   :  { %143 = vmatmul.mubr.bf16.vlgmr.msra.gmra.mxu0 %v815_v24 }
  0x2a   :  { %264 = vmatmul.mubr.bf16.vlgmr.msra.gmra.mxu1 %v815_v24  ;;  %355 = vmatpush1.bf16.msra.mxu0 %v683_v25 }
  0x2b   :  { %478 = vmatpush1.bf16.msra.mxu1 %v684_v26  ;;  %356 = vmatprep.subr.bf16.mxu0 %v703_v0 }
  0x2c   :  { %479 = vmatprep.subr.bf16.mxu1 %v703_v0  ;;  %623 = vmatprep.mubr.msk.bf16.mxu0 %vm102_vm0, %v680_v13 }
  0x2d   :  { %653 = vmatprep.mubr.msk.bf16.mxu1 %vm102_vm0, %v680_v13 }
  0x2e   :  { %357 = vmatpush1.bf16.msra.mxu0 %v685_v28 }
  0x2f   :  { %480 = vmatpush1.bf16.msra.mxu1 %v686_v30  ;;  %358 = vmatprep.subr.bf16.mxu0 %v703_v0 }
  0x30   :  { %481 = vmatprep.subr.bf16.mxu1 %v703_v0 }
  0x32   :  { %359 = vmatpush1.bf16.msra.mxu0 %v687_v31 }
  0x33   :  { %482 = vmatpush1.bf16.msra.mxu1 %v688_v32  ;;  %360 = vmatprep.subr.bf16.mxu0 %v703_v0 }
  0x34   :  { %483 = vmatprep.subr.bf16.mxu1 %v703_v0 }
  0x36   :  { %361 = vmatpush1.bf16.msra.mxu0 %v689_v33 }
  0x37   :  { %484 = vmatpush1.bf16.msra.mxu1 %v690_v34  ;;  %362 = vmatprep.subr.bf16.mxu0 %v703_v0 }
  0x38   :  { %485 = vmatprep.subr.bf16.mxu1 %v703_v0 }
  0x3a   :  { %363 = vmatpush1.bf16.msra.mxu0 %v691_v35 }
  0x3b   :  { %486 = vmatpush1.bf16.msra.mxu1 %v692_v36  ;;  %364 = vmatprep.subr.bf16.mxu0 %v703_v0 }
  0x3c   :  { %487 = vmatprep.subr.bf16.mxu1 %v703_v0 }
  0x3e   :  { %365 = vmatpush1.bf16.msra.mxu0 %v693_v37 }
  0x3f   :  { %488 = vmatpush1.bf16.msra.mxu1 %v694_v38  ;;  %366 = vmatprep.subr.bf16.mxu0 %v703_v0 }
  0x40   :  { %489 = vmatprep.subr.bf16.mxu1 %v703_v0 }
  0x42   :  { %367 = vmatpush1.bf16.msra.mxu0 %v695_v39 }
  0x43   :  { %490 = vmatpush1.bf16.msra.mxu1 %v696_v40  ;;  %368 = vmatprep.subr.bf16.mxu0 %v703_v0 }
  0x44   :  { %491 = vmatprep.subr.bf16.mxu1 %v703_v0 }
  0x46   :  { %369 = vmatpush1.bf16.msra.mxu0 %v697_v41 }
  0x47   :  { %492 = vmatpush1.bf16.msra.mxu1 %v698_v42  ;;  %382 = vmatprep.subr.bf16.mxu0 %v703_v0 }
  0x48   :  { %505 = vmatprep.subr.bf16.mxu1 %v703_v0 }
  0x4a   :  { %383 = vmatpush2.bf16.msra.mxu0 %v352_v45 }
  0x4b   :  { %506 = vmatpush2.bf16.msra.mxu1 %v475_v46  ;;  %384 = vmatprep.subr.bf16.mxu0 %v703_v0 }
  0x4c   :  { %507 = vmatprep.subr.bf16.mxu1 %v703_v0 }
  0x4e   :  { %385 = vmatpush2.bf16.msra.mxu0 %v701_v47 }
  0x4f   :  { %508 = vmatpush2.bf16.msra.mxu1 %v702_v48 }
  0x51   :  { %387 = vmatmul.mubr.bf16.vlgmr.msra.gmra.mxu0 %v815_v24 }
  0x52   :  { %510 = vmatmul.mubr.bf16.vlgmr.msra.gmra.mxu1 %v815_v24 }
  0x87   :  { %v525_v61 = vpop.permute.xlu0 %524 }
  0x8b   :  { %v530_v10 = vpop.permute.xlu0 %529 }
  0xe9   :  { %v144_v49 = vpop.f32.mrf.mxu0 }
  0xea   :  { %v265_v50 = vpop.f32.mrf.mxu1 }
  0xeb   :  { %v146_v51 = vpop.f32.mrf.mxu0  ;;  %v272_v57 = vmax.f32 %v144_v49, %v265_v50 }
  0xec   :  { %v267_v52 = vpop.f32.mrf.mxu1 }
  0xed   :  { %v147_v53 = vpop.f32.mrf.mxu0 }
  0xee   :  { %v268_v54 = vpop.f32.mrf.mxu1 }
  0xef   :  { %v149_v55 = vpop.f32.mrf.mxu0  ;;  %v273_v63 = vmax.f32 %v147_v53, %v268_v54 }
  0xf0   :  { %v270_v56 = vpop.f32.mrf.mxu1 }
 0x111   :  { %v388_v58 = vpop.f32.mrf.mxu0 }
 0x112   :  { %v395_v59 = vmax.f32 %v272_v57, %v388_v58  ;;  %v511_v60 = vpop.f32.mrf.mxu1 }
 0x113   :  { %v390_v62 = vpop.f32.mrf.mxu0 }
 0x114   :  { %v518_v0 = vmax.f32 %v395_v59, %v511_v60  ;;  %v513_v1 = vpop.f32.mrf.mxu1 }
 0x115   :  { %v391_v2 = vpop.f32.mrf.mxu0 }
 0x116   :  { %v532_v3 = vadd.f32 %v525_v61, %v518_v0  ;;  %v396_v4 = vmax.f32 %v273_v63, %v391_v2  ;;  %v514_v5 = vpop.f32.mrf.mxu1 }
 0x117   :  { %v393_v6 = vpop.f32.mrf.mxu0 }
 0x118   :  { %v534_v7 = vmax.f32 %v532_v3, 0.0  ;;  %v519_v8 = vmax.f32 %v396_v4, %v514_v5  ;;  %v516_v9 = vpop.f32.mrf.mxu1 }
 0x11a   :  { %v656_v11 = vpack.c.bf16 %v534_v7, %v534_v7  ;;  %v533_v12 = vadd.f32 %v530_v10, %v519_v8 }
 0x11c   :  { %545 = vst.msk [vmem:[%s920_s3] sm:$0xf] %vm544_vm2, %v656_v11  ;;  %v535_v13 = vmax.f32 %v533_v12, 0.0 }
 0x11e   :  { %v657_v14 = vpack.c.bf16 %v535_v13, %v535_v13 }
 0x120   :  { %546 = vst.msk [vmem:[%s920_s3 + $0x4] sm:$0xf] %vm544_vm2, %v657_v14 }

// kernel: cnn_forward.5
= control target key start
LH: loop header
LB: loop body
LE: loop exit
PB: predicated region body
PF: predicated region fallthrough
CT: control target
= control target key end

     0   :  { %v644_v2 = vmov 0.0   ;;  %v80_v9 = vlaneseq  ;;  %vm302_vm0 = vcmask 1043456   ;;  %v645_v15 = vmov 1966171168   ;;  %s812_s0 = inlined_call_operand.vmem [shape: bf16[2,256], index: 0, kind: input, shape index: {}]   ;;  %s813_s1 = inlined_call_operand.vmem [shape: bf16[256,120], index: 1, kind: input, shape index: {}]   ;;  %s814_s2 = inlined_call_operand.vmem [shape: f32[1,120], index: 2, kind: input, shape index: {}]   ;;  %s815_s3 = inlined_call_operand.vmem [shape: bf16[120,84], index: 3, kind: input, shape index: {}]   ;;  %s816_s4 = inlined_call_operand.vmem [shape: f32[1,84], index: 4, kind: input, shape index: {}]   ;;  %s817_s5 = inlined_call_operand.vmem [shape: bf16[84,10], index: 5, kind: input, shape index: {}]   ;;  %s818_s6 = inlined_call_operand.vmem [shape: f32[1,10], index: 6, kind: input, shape index: {}]   ;;  %s819_s7 = inlined_call_operand.hbm [shape: f32[2,10], index: 7, kind: output, shape index: {}]  }
   0x1   :  { %v588_v0 = vld [vmem:[%s813_s1 + $0x78] sm:$0xff]   ;;  %548 = vmatprep.subr.bf16.mxu1 %v644_v2  ;;  %v590_v3 = vld [vmem:[%s813_s1 + $0x70] sm:$0xff]   ;;  %v592_v5 = vld [vmem:[%s813_s1 + $0x68] sm:$0xff]   ;;  %v78_v16 = vunpack.c.l.s4 %v645_v15 }
   0x2   :  { %v589_v1 = vld [vmem:[%s813_s1 + $0x38] sm:$0xff]   ;;  %510 = vmatprep.subr.bf16.mxu0 %v588_v0  ;;  %v591_v4 = vld [vmem:[%s813_s1 + $0x30] sm:$0xff]   ;;  %v593_v6 = vld [vmem:[%s813_s1 + $0x28] sm:$0xff]   ;;  %v81_v13 = vshrl.u32 %v80_v9, 7 }
   0x3   :  { %511 = vmatpush3.bf16.msra.mxu0 %v589_v1  ;;  %v594_v7 = vld [vmem:[%s813_s1 + $0x60] sm:$0xff]   ;;  %v596_v10 = vld [vmem:[%s813_s1 + $0x58] sm:$0xff]   ;;  %v598_v12 = vld [vmem:[%s813_s1 + $0x50] sm:$0xff]   ;;  %v79_v21 = vunpack.c.0.s8 %v78_v16 }
   0x4   :  { %512 = vmatprep.subr.bf16.mxu0 %v590_v3  ;;  %v595_v8 = vld [vmem:[%s813_s1 + $0x20] sm:$0xff]   ;;  %v597_v11 = vld [vmem:[%s813_s1 + $0x18] sm:$0xff]   ;;  %v599_v18 = vld [vmem:[%s813_s1 + $0x10] sm:$0xff]  }
   0x5   :  { %v475_v14 = vld.sshfl [vmem:[%s812_s0] sm:$0x11 pattern:$0x75316420]  ;;  %v604_v17 = vld [vmem:[%s815_s3 + $0x38] ss:$0 sps:$4 sm:$0xff]   ;;  %v82_v25 = vsub.s32 %v79_v21, %v81_v13 }
   0x6   :  { %v600_v19 = vld [vmem:[%s813_s1 + $0x48] sm:$0xff]   ;;  %v76_v20 = vcombine.high %v475_v14, %v475_v14  ;;  %v304_v22 = vsel %vm302_vm0, %v604_v17, 0  ;;  %v605_v23 = vld [vmem:[%s815_s3 + $0x30] sm:$0xff]   ;;  %v602_v26 = vld [vmem:[%s813_s1 + $0x40] sm:$0xff]  }
   0x7   :  { %513 = vmatpush3.bf16.msra.mxu0 %v591_v4  ;;  %549 = vmatpush3.bf16.msra.mxu1 %v304_v22  ;;  %v601_v24 = vld [vmem:[%s813_s1 + $0x8] sm:$0xff]   ;;  %v603_v29 = vld [vmem:[%s813_s1] sm:$0xff]  }
   0x8   :  { %514 = vmatprep.subr.bf16.mxu0 %v592_v5  ;;  %550 = vmatprep.subr.bf16.mxu1 %v644_v2  ;;  %v606_v27 = vld [vmem:[%s815_s3 + $0x28] sm:$0xff]   ;;  %v90_v28 = vrot.slane %v76_v20, %v82_v25 }
   0xa   :  { %221 = vmatprep.mubr.bf16.mxu0 %v90_v28 }
   0xb   :  { %515 = vmatpush3.bf16.msra.mxu0 %v593_v6  ;;  %551 = vmatpush3.bf16.msra.mxu1 %v605_v23 }
   0xc   :  { %516 = vmatprep.subr.bf16.mxu0 %v594_v7  ;;  %552 = vmatprep.subr.bf16.mxu1 %v644_v2 }
   0xf   :  { %517 = vmatpush3.bf16.msra.mxu0 %v595_v8 }
  0x10   :  { %518 = vmatprep.subr.bf16.mxu0 %v596_v10 }
  0x13   :  { %519 = vmatpush3.bf16.msra.mxu0 %v597_v11 }
  0x14   :  { %520 = vmatprep.subr.bf16.mxu0 %v598_v12 }
  0x17   :  { %521 = vmatpush3.bf16.msra.mxu0 %v599_v18 }
  0x18   :  { %522 = vmatprep.subr.bf16.mxu0 %v600_v19 }
  0x1b   :  { %523 = vmatpush3.bf16.msra.mxu0 %v601_v24 }
  0x1c   :  { %12 = vsyncpa [#allocation3], 0  ;;  %524 = vmatprep.subr.bf16.mxu0 %v602_v26  ;;  %553 = vmatpush3.bf16.msra.mxu1 %v606_v27  ;;  %v607_v30 = vld [vmem:[%s815_s3 + $0x20] sm:$0xff]   ;;  %v83_v31 = vrot.slane %v475_v14, %v82_v25  ;;  %v608_v32 = vld [vmem:[%s815_s3 + $0x18] sm:$0xff]   ;;  %vm646_vm1 = vmmov 0   ;;  %vm403_vm2 = vcmask 1041408  }
  0x1d   :  { %554 = vmatprep.subr.bf16.mxu1 %v644_v2  ;;  %v609_v33 = vld [vmem:[%s815_s3 + $0x10] sm:$0xff]   ;;  %v610_v34 = vld [vmem:[%s815_s3 + $0x8] sm:$0xff]   ;;  %v611_v35 = vld [vmem:[%s815_s3] sm:$0xff]   ;;  %564 = vmatprep.mubr.msk.bf16.mxu1 %vm646_vm1, %v644_v2  ;;  %vm298_vm3 = vcmask 982016   ;;  %vm399_vm4 = vcmask 687104   ;;  %vm447_vm5 = vcmask 74752  }
  0x1e   :  { %v612_v36 = vld [vmem:[%s817_s5 + $0x28] ss:$0 sps:$4 sm:$0x33]   ;;  %v613_v38 = vld [vmem:[%s817_s5 + $0x20] sm:$0xff]   ;;  %v614_v39 = vld [vmem:[%s817_s5 + $0x18] sm:$0xff]  }
  0x1f   :  { %525 = vmatpush3.bf16.msra.mxu0 %v603_v29  ;;  %v405_v37 = vsel %vm403_vm2, %v612_v36, 0  ;;  %v615_v40 = vld [vmem:[%s817_s5 + $0x10] sm:$0xff]   ;;  %v474_v42 = vld [vmem:[%s814_s2] ss:$0 sm:$0xff]  ;;  %v616_v50 = vld [vmem:[%s817_s5 + $0x8] sm:$0xff]  }
  0x20   :  { %555 = vmatpush3.bf16.msra.mxu1 %v607_v30  ;;  %568 = vmatprep.subr.bf16.mxu0 %v644_v2  ;;  %v617_v51 = vld [vmem:[%s817_s5] sm:$0xff]  }
  0x21   :  { %556 = vmatprep.subr.bf16.mxu1 %v644_v2  ;;  %v492_v52 = vld [vmem:[%s816_s4] ss:$0 sm:$0xff]  ;;  %s647_s4 = smov [#allocation2]  }
  0x22   :  { %222 = vmatmul.mubr.bf16.vlgmr.msra.gmra.mxu0 %v83_v31  ;;  %v502_v60 = vld [vmem:[%s818_s6] ss:$0 sm:$0xff]  ;;  %s466_s5 = sshll.u32 %s647_s4, 4  ;;  %s467_s5 = int_to_ptr.vmem [resolvable:$true] %s466_s5 }
  0x23   :  { %580 = vmatprep.mubr.msk.bf16.mxu0 %vm646_vm1, %v644_v2  ;;  %569 = vmatpush3.bf16.msra.mxu0 %v405_v37  ;;  %s622_s6 = scalar_lea.vmem %s467_s5, 32  ;;  %p627_p1 = scmp.lt.s32.totalorder %s467_s5, %s467_s5 }
  0x24   :  { %557 = vmatpush3.bf16.msra.mxu1 %v608_v32  ;;  %570 = vmatprep.subr.bf16.mxu0 %v644_v2  ;;  %p623_p0 = scmp.ne.s32.totalorder %s467_s5, %s622_s6  ;;  %p628_p2 = scmp.lt.s32.totalorder %s622_s6, %s622_s6 }
  0x25   :  { %558 = vmatprep.subr.bf16.mxu1 %v644_v2 }
  0x26   :  { %p629_p3 = por %p628_p2, %p627_p1 }
  0x27   :  { %571 = vmatpush3.bf16.msra.mxu0 %v613_v38 }
  0x28   :  { %559 = vmatpush3.bf16.msra.mxu1 %v609_v33  ;;  %572 = vmatprep.subr.bf16.mxu0 %v644_v2  ;;  %p630_p4 = pnand %p629_p3, %p623_p0 }
  0x29   :  { %560 = vmatprep.subr.bf16.mxu1 %v644_v2 }
  0x2b   :  { %573 = vmatpush3.bf16.msra.mxu0 %v614_v39 }
  0x2c   :  { %561 = vmatpush3.bf16.msra.mxu1 %v610_v34  ;;  %574 = vmatprep.subr.bf16.mxu0 %v644_v2 }
  0x2d   :  { %562 = vmatprep.subr.bf16.mxu1 %v644_v2 }
  0x2f   :  { %575 = vmatpush3.bf16.msra.mxu0 %v615_v40 }
  0x30   :  { %563 = vmatpush3.bf16.msra.mxu1 %v611_v35  ;;  %576 = vmatprep.subr.bf16.mxu0 %v644_v2 }
  0x33   :  { %577 = vmatpush3.bf16.msra.mxu0 %v616_v50 }
  0x34   :  { %578 = vmatprep.subr.bf16.mxu0 %v644_v2 }
  0x37   :  { %579 = vmatpush3.bf16.msra.mxu0 %v617_v51 }
  0xe2   :  { %v526_v41 = vpop.f32.mrf.mxu0 }
  0xe4   :  { %v527_v43 = vpop.f32.mrf.mxu0 }
  0xe5   :  { %v528_v44 = vadd.f32 %v527_v43, %v526_v41 }
  0xe6   :  { %v529_v45 = vpop.f32.mrf.mxu0 }
  0xe7   :  { %v224_v46 = vadd.f32 %v528_v44, %v474_v42 }
  0xe8   :  { %v530_v47 = vpop.f32.mrf.mxu0 }
  0xe9   :  { %v229_v48 = vmax.f32 %v224_v46, 0.0 }
  0xeb   :  { %v230_v49 = vpack.c.bf16 %v229_v48, %v229_v48 }
  0xed   :  { %565 = vmatmul.mubr.msk.bf16.vlgmr.msra.gmra.mxu1 %vm298_vm3, %v230_v49 }
 0x1ad   :  { %v340_v53 = vpop.f32.mrf.mxu1 }
 0x1ae   :  { %v341_v54 = vadd.f32 %v492_v52, %v340_v53 }
 0x1af   :  { %v566_v55 = vpop.f32.mrf.mxu1 }
 0x1b0   :  { %v346_v56 = vmax.f32 %v341_v54, 0.0 }
 0x1b1   :  { %v343_v57 = vpop.f32.mrf.mxu1 }
 0x1b2   :  { %v347_v58 = vpack.c.bf16 %v346_v56, %v346_v56 }
 0x1b3   :  { %v567_v59 = vpop.f32.mrf.mxu1 }
 0x1b4   :  { %581 = vmatmul.mubr.msk.bf16.vlgmr.msra.gmra.mxu0 %vm399_vm4, %v347_v58 }
 0x274   :  { %v441_v61 = vpop.f32.mrf.mxu0 }
 0x275   :  { %v442_v62 = vadd.f32 %v502_v60, %v441_v61 }
 0x276   :  { %v582_v63 = vpop.f32.mrf.mxu0 }
 0x277   :  { %v448_v0 = vsel %vm447_vm5, %v442_v62, -inf }
 0x278   :  { %449 = vmax.xlane.f32.xlu0 %v448_v0  ;;  %v444_v1 = vpop.f32.mrf.mxu0 }
 0x27a   :  { %v583_v2 = vpop.f32.mrf.mxu0 }
 0x301   :  { %v450_v3 = vpop.xlane.xlu0 %449 }
 0x302   :  { %v451_v4 = vsub.f32 %v442_v62, %v450_v3 }
 0x304   :  { %v452_v5 = vmul.f32 1.442695, %v451_v4 }
 0x306   :  { %618 = vpow2.f32 %v452_v5 }
 0x313   :  { %v619_v6 = vpop.eup %618 }
 0x314   :  { %v454_v7 = vsel %vm447_vm5, %v619_v6, 0.0 }
 0x315   :  { %455 = vadd.xlane.f32.xlu0 %v454_v7 }
 0x39e   :  { %v456_v8 = vpop.xlane.xlu0 %455 }
 0x39f   :  { %620 = vrcp.f32 %v456_v8 }
 0x3ac   :  { %v621_v9 = vpop.eup %620 }
 0x3ad   :  { %v458_v10 = vmul.f32 %v621_v9, %v619_v6 }
 0x3af   :  { %459 = vst.msk [vmem:[#allocation2] sm:$0x3] %vm447_vm5, %v458_v10 }
 0x3b0   :  { %633 = shalt.err (!%p630_p4)
}
 0x3b1   :  { %469 = dma.vmem_to_hbm [thread:$0]  %s467_s5, 32, %s819_s7, [#allocation3]  }
 0x3b2   :  { %642 = dma.done.wait [#allocation3], 32  }
 0x3b3   :  { %643 = vsyncadd [#allocation3], 4294967264 }
 0x3b4   :  { %473 = vsyncpa [#allocation3], 1 }

</bundles_post_ra>
